<compile_context>
chip_gen: v7x
topology: tpu7x:2x2x1
jax: 0.10.0
libtpu: 0.0.40
codegen_flags: <defaults>
</compile_context>

<pallas_src>
import functools

import jax
import jax.numpy as jnp
from jax.experimental import pallas as pl
from jax.experimental.pallas import tpu as pltpu


def _round_up(x, m):
    return ((x + m - 1) // m) * m


def _seal_mlp_kernel(z_ref, batch_ref, w1t_ref, b1_ref, w2t_ref, b2_ref,
                     out_ref, acc_ref, *, b_pad, e_pad, pooling):
    i = pl.program_id(0)

    @pl.when(i == 0)
    def _():
        acc_ref[...] = jnp.zeros_like(acc_ref)

    tile_n = z_ref.shape[0]
    z_col = z_ref[...]       # (TILE_N, 1) int32 — sublane-major (broadcasts over lanes)
    b_row = batch_ref[...]   # (1, TILE_N) int32 — lane-major   (broadcasts over sublanes)

    # One-hot matrices built directly in MXU-native orientation; bf16 is exact
    # for 0/1 values and halves the operand footprint feeding the MXU.
    onehot_z = (jax.lax.broadcasted_iota(jnp.int32, (tile_n, e_pad), 1)
                == z_col).astype(jnp.bfloat16)                    # (TILE_N, E_pad)
    onehot_bT = (jax.lax.broadcasted_iota(jnp.int32, (b_pad, tile_n), 0)
                 == b_row).astype(jnp.bfloat16)                   # (B_pad, TILE_N)

    # pooled[g, e] += sum_{n in tile : batch[n]==g} onehot_z[n, e]
    acc_ref[...] += jnp.dot(onehot_bT, onehot_z,
                            preferred_element_type=jnp.float32)

    @pl.when(i == pl.num_programs(0) - 1)
    def _():
        pooled = acc_ref[...]                                     # (B_pad, E_pad) f32
        if pooling == "mean":
            # Every real node contributes exactly one 1 to its graph's row,
            # so the per-graph node count is the row-sum of the accumulator.
            counts = jnp.sum(pooled, axis=1, keepdims=True)       # (B_pad, 1)
            pooled = pooled / jnp.maximum(counts, 1.0)

        # lin1 + ReLU
        h = jnp.dot(pooled, w1t_ref[...],
                    preferred_element_type=jnp.float32) + b1_ref[...]
        h = jnp.maximum(h, 0.0)

        # (dropout skipped: eval / training=False)

        # lin2 (output columns >= 1 are zero-padded in W2^T; wrapper slices col 0)
        out = jnp.dot(h, w2t_ref[...],
                      preferred_element_type=jnp.float32) + b2_ref[0, 0]
        out_ref[...] = out.astype(out_ref.dtype)


def seal_mlp_forward(z, batch, w1, b1, w2, b2, *, num_graphs, pooling="mean",
                     tile_n=512):
    """z: (N,) int labels in [0, emb_dim); batch: (N,) graph ids in [0, num_graphs)."""
    assert tile_n % 128 == 0, "tile_n must be a multiple of 128"
    N = z.shape[0]
    E = w1.shape[0]
    B = num_graphs

    e_pad = _round_up(E, 128)       # lane-dense feature dim
    b_pad = _round_up(B, 8)         # sublane-aligned graph dim
    out_pad = 128                   # lane-dense output columns (only col 0 is real)
    n_pad = _round_up(max(N, 1), tile_n)

    # Pad node arrays. Padded nodes get batch = -1 so they match no graph row.
    z_p = jnp.zeros((n_pad,), jnp.int32).at[:N].set(jnp.asarray(z, jnp.int32))
    bt_p = jnp.full((n_pad,), -1, jnp.int32).at[:N].set(jnp.asarray(batch, jnp.int32))
    z_col = z_p.reshape(n_pad, 1)        # sublane-major (needed for the E-axis compare)
    bt_row = bt_p.reshape(1, n_pad)      # lane-major

    # Pre-transposed, zero-padded weights / biases.
    w1t = jnp.zeros((e_pad, e_pad), jnp.float32).at[:E, :E].set(
        jnp.asarray(w1, jnp.float32).T)
    b1r = jnp.zeros((1, e_pad), jnp.float32).at[0, :E].set(
        jnp.asarray(b1, jnp.float32))
    w2t = jnp.zeros((e_pad, out_pad), jnp.float32).at[:E, :1].set(
        jnp.asarray(w2, jnp.float32).T)
    b2r = jnp.asarray(b2, jnp.float32).reshape(1, 1)

    kernel = functools.partial(_seal_mlp_kernel, b_pad=b_pad, e_pad=e_pad,
                               pooling=pooling)

    out_padded = pl.pallas_call(
        kernel,
        out_shape=jax.ShapeDtypeStruct((b_pad, out_pad), jnp.float32),
        grid=(n_pad // tile_n,),
        in_specs=[
            pl.BlockSpec((tile_n, 1), lambda i: (i, 0)),          # z tile
            pl.BlockSpec((1, tile_n), lambda i: (0, i)),          # batch tile
            pl.BlockSpec((e_pad, e_pad), lambda i: (0, 0)),       # W1^T (resident)
            pl.BlockSpec((1, e_pad), lambda i: (0, 0)),           # b1   (resident)
            pl.BlockSpec((e_pad, out_pad), lambda i: (0, 0)),     # W2^T (resident)
            pl.BlockSpec(memory_space=pltpu.MemorySpace.SMEM),    # b2 scalar
        ],
        out_specs=pl.BlockSpec((b_pad, out_pad), lambda i: (0, 0)),
        scratch_shapes=[pltpu.VMEM((b_pad, e_pad), jnp.float32)],
        compiler_params=pltpu.CompilerParams(
            dimension_semantics=("arbitrary",)),
    )(z_col, bt_row, w1t, b1r, w2t, b2r)

    return out_padded[:B, :1]


def _reference(z, batch, w1, b1, w2, b2, *, num_graphs, pooling):
    E = w1.shape[0]
    x = jax.nn.one_hot(z, E, dtype=jnp.float32)                     # (N, E)
    seg_sum = jax.ops.segment_sum(x, batch, num_segments=num_graphs)
    if pooling == "mean":
        cnt = jax.ops.segment_sum(jnp.ones_like(z, jnp.float32), batch,
                                  num_segments=num_graphs)
        pooled = seg_sum / jnp.maximum(cnt, 1.0)[:, None]
    else:
        pooled = seg_sum
    h = jax.nn.relu(pooled @ w1.T + b1)
    return h @ w2.T + b2


if __name__ == "__main__":
    # Small, deterministic setup consistent with SEALMLP:
    #   emb_dim = get_max_label(...) + 1  -> pick 32
    #   N = 300 nodes across B = 3 graphs, label_pooling = 'mean'
    #   tile_n = 128 so the grid has multiple steps (exercises accumulation).
    EMB_DIM = 32
    NUM_GRAPHS = 3
    GRAPH_SIZES = (120, 80, 100)
    N_NODES = sum(GRAPH_SIZES)
    POOLING = "mean"

    key = jax.random.PRNGKey(0)
    k_z, k_w1, k_b1, k_w2, k_b2 = jax.random.split(key, 5)

    z = jax.random.randint(k_z, (N_NODES,), 0, EMB_DIM, dtype=jnp.int32)
    batch = jnp.concatenate([
        jnp.full((sz,), g, jnp.int32) for g, sz in enumerate(GRAPH_SIZES)
    ])

    # PyTorch Linear-style init: uniform(-1/sqrt(fan_in), 1/sqrt(fan_in))
    bound1 = 1.0 / (EMB_DIM ** 0.5)
    w1 = jax.random.uniform(k_w1, (EMB_DIM, EMB_DIM), jnp.float32, -bound1, bound1)
    b1 = jax.random.uniform(k_b1, (EMB_DIM,), jnp.float32, -bound1, bound1)
    w2 = jax.random.uniform(k_w2, (1, EMB_DIM), jnp.float32, -bound1, bound1)
    b2 = jax.random.uniform(k_b2, (1,), jnp.float32, -bound1, bound1)

    out = seal_mlp_forward(z, batch, w1, b1, w2, b2,
                           num_graphs=NUM_GRAPHS, pooling=POOLING, tile_n=128)
    out = jax.block_until_ready(out)

    ref = _reference(z, batch, w1, b1, w2, b2,
                     num_graphs=NUM_GRAPHS, pooling=POOLING)
    assert out.shape == (NUM_GRAPHS, 1)
    assert jnp.allclose(out, ref, atol=1e-5, rtol=1e-5), (out, ref)

    print("KERNEL_OK")
</pallas_src>

<mosaic_0001>
module attributes {stable_mosaic.version = 11 : i64} {
  func.func @_seal_mlp_kernel(%arg0: i32, %arg1: memref<128x1xi32, #tpu.memory_space<vmem>>, %arg2: memref<1x128xi32, #tpu.memory_space<vmem>>, %arg3: memref<128x128xf32, #tpu.memory_space<vmem>>, %arg4: memref<1x128xf32, #tpu.memory_space<vmem>>, %arg5: memref<128x128xf32, #tpu.memory_space<vmem>>, %arg6: memref<1x1xf32, #tpu.memory_space<smem>>, %arg7: memref<8x128xf32, #tpu.memory_space<vmem>>, %arg8: memref<8x128xf32, #tpu.memory_space<vmem>>) attributes {dimension_semantics = [#tpu.dimension_semantics<arbitrary>], iteration_bounds = array<i64: 3>, scalar_prefetch = 0 : i64, scratch_operands = 1 : i64, tpu.core_type = #tpu.core_type<tc>, window_params = [{transform_indices = @transform_0, window_bounds = array<i64: 128, 1>}, {transform_indices = @transform_1, window_bounds = array<i64: 1, 128>}, {pipeline_mode = #tpu.pipeline_mode<synchronous>, transform_indices = @transform_2, window_bounds = array<i64: 128, 128>}, {pipeline_mode = #tpu.pipeline_mode<synchronous>, transform_indices = @transform_3, window_bounds = array<i64: 1, 128>}, {pipeline_mode = #tpu.pipeline_mode<synchronous>, transform_indices = @transform_4, window_bounds = array<i64: 128, 128>}, {transform_indices = @transform_5, window_bounds = array<i64: 1, 1>}, {pipeline_mode = #tpu.pipeline_mode<synchronous>, transform_indices = @transform_6, window_bounds = array<i64: 8, 128>}]} {
    %c0_i32 = arith.constant 0 : i32
    %0 = arith.cmpi eq, %arg0, %c0_i32 : i32
    %1 = arith.extui %0 : i1 to i32
    %c0_i32_0 = arith.constant 0 : i32
    %2 = arith.cmpi ne, %1, %c0_i32_0 : i32
    scf.if %2 {
      %cst_9 = arith.constant 0.000000e+00 : f32
      %24 = vector.broadcast %cst_9 : f32 to vector<8x128xf32>
      %c0_10 = arith.constant 0 : index
      %c0_11 = arith.constant 0 : index
      %25 = vector.load %arg8[%c0_10, %c0_11] : memref<8x128xf32, #tpu.memory_space<vmem>>, vector<8x128xf32>
      tpu.vector_store %arg8[%c0_10, %c0_11], %24 {strides = array<i32>} : memref<8x128xf32, #tpu.memory_space<vmem>>, vector<8x128xf32>,
    } else {
    }
    %c0 = arith.constant 0 : index
    %c0_1 = arith.constant 0 : index
    %3 = vector.load %arg1[%c0, %c0_1] : memref<128x1xi32, #tpu.memory_space<vmem>>, vector<128x1xi32>
    %c0_2 = arith.constant 0 : index
    %c0_3 = arith.constant 0 : index
    %4 = vector.load %arg2[%c0_2, %c0_3] : memref<1x128xi32, #tpu.memory_space<vmem>>, vector<1x128xi32>
    %5 = tpu.iota {dimensions = array<i32: 1>} : vector<128x128xi32>
    %6 = vector.broadcast %3 : vector<128x1xi32> to vector<128x128xi32>
    %7 = arith.cmpi eq, %5, %6 : vector<128x128xi32>
    %8 = arith.extui %7 : vector<128x128xi1> to vector<128x128xi32>
    %9 = arith.sitofp %8 : vector<128x128xi32> to vector<128x128xf32>
    %10 = arith.truncf %9 : vector<128x128xf32> to vector<128x128xbf16>
    %11 = tpu.iota {dimensions = array<i32: 0>} : vector<8x128xi32>
    %12 = vector.broadcast %4 : vector<1x128xi32> to vector<8x128xi32>
    %13 = arith.cmpi eq, %11, %12 : vector<8x128xi32>
    %14 = arith.extui %13 : vector<8x128xi1> to vector<8x128xi32>
    %15 = arith.sitofp %14 : vector<8x128xi32> to vector<8x128xf32>
    %16 = arith.truncf %15 : vector<8x128xf32> to vector<8x128xbf16>
    %c0_4 = arith.constant 0 : index
    %c0_5 = arith.constant 0 : index
    %17 = vector.load %arg8[%c0_4, %c0_5] : memref<8x128xf32, #tpu.memory_space<vmem>>, vector<8x128xf32>
    %cst = arith.constant dense<0.000000e+00> : vector<8x128xf32>
    %18 = tpu.matmul %16, %10, %cst {dimension_numbers = #tpu.dot_dimension_numbers<[1], [0], [0], [1], [0, 0, 1, 1], [], []>} : vector<8x128xbf16>, vector<128x128xbf16>, vector<8x128xf32> -> vector<8x128xf32>
    %19 = arith.addf %17, %18 : vector<8x128xf32>
    %c0_6 = arith.constant 0 : index
    %c0_7 = arith.constant 0 : index
    %20 = vector.load %arg8[%c0_6, %c0_7] : memref<8x128xf32, #tpu.memory_space<vmem>>, vector<8x128xf32>
    tpu.vector_store %arg8[%c0_6, %c0_7], %19 {strides = array<i32>} : memref<8x128xf32, #tpu.memory_space<vmem>>, vector<8x128xf32>,
    %c2_i32 = arith.constant 2 : i32
    %21 = arith.cmpi eq, %arg0, %c2_i32 : i32
    %22 = arith.extui %21 : i1 to i32
    %c0_i32_8 = arith.constant 0 : i32
    %23 = arith.cmpi ne, %22, %c0_i32_8 : i32
    scf.if %23 {
      %c0_9 = arith.constant 0 : index
      %c0_10 = arith.constant 0 : index
      %24 = vector.load %arg8[%c0_9, %c0_10] : memref<8x128xf32, #tpu.memory_space<vmem>>, vector<8x128xf32>
      %cst_11 = arith.constant dense<0.000000e+00> : vector<8xf32>
      %25 = vector.multi_reduction <add>, %24, %cst_11 [1] : vector<8x128xf32> to vector<8xf32>
      %26 = vector.shape_cast %25 : vector<8xf32> to vector<8x1xf32>
      %cst_12 = arith.constant 1.000000e+00 : f32
      %27 = vector.broadcast %cst_12 : f32 to vector<8x1xf32>
      %28 = arith.maximumf %26, %27 : vector<8x1xf32>
      %29 = vector.broadcast %28 : vector<8x1xf32> to vector<8x128xf32>
      %30 = arith.divf %24, %29 : vector<8x128xf32>
      %c0_13 = arith.constant 0 : index
      %c0_14 = arith.constant 0 : index
      %31 = vector.load %arg3[%c0_13, %c0_14] : memref<128x128xf32, #tpu.memory_space<vmem>>, vector<128x128xf32>
      %cst_15 = arith.constant dense<0.000000e+00> : vector<8x128xf32>
      %32 = tpu.matmul %30, %31, %cst_15 {dimension_numbers = #tpu.dot_dimension_numbers<[1], [0], [0], [1], [0, 0, 1, 1], [], []>} : vector<8x128xf32>, vector<128x128xf32>, vector<8x128xf32> -> vector<8x128xf32>
      %c0_16 = arith.constant 0 : index
      %c0_17 = arith.constant 0 : index
      %33 = vector.load %arg4[%c0_16, %c0_17] : memref<1x128xf32, #tpu.memory_space<vmem>>, vector<1x128xf32>
      %34 = vector.broadcast %33 : vector<1x128xf32> to vector<8x128xf32>
      %35 = arith.addf %32, %34 : vector<8x128xf32>
      %cst_18 = arith.constant 0.000000e+00 : f32
      %36 = vector.broadcast %cst_18 : f32 to vector<8x128xf32>
      %37 = arith.maximumf %35, %36 : vector<8x128xf32>
      %c0_19 = arith.constant 0 : index
      %c0_20 = arith.constant 0 : index
      %38 = vector.load %arg5[%c0_19, %c0_20] : memref<128x128xf32, #tpu.memory_space<vmem>>, vector<128x128xf32>
      %cst_21 = arith.constant dense<0.000000e+00> : vector<8x128xf32>
      %39 = tpu.matmul %37, %38, %cst_21 {dimension_numbers = #tpu.dot_dimension_numbers<[1], [0], [0], [1], [0, 0, 1, 1], [], []>} : vector<8x128xf32>, vector<128x128xf32>, vector<8x128xf32> -> vector<8x128xf32>
      %c0_22 = arith.constant 0 : index
      %c0_23 = arith.constant 0 : index
      %40 = memref.load %arg6[%c0_22, %c0_23] : memref<1x1xf32, #tpu.memory_space<smem>>
      %41 = vector.broadcast %40 : f32 to vector<8x128xf32>
      %42 = arith.addf %39, %41 : vector<8x128xf32>
      %c0_24 = arith.constant 0 : index
      %c0_25 = arith.constant 0 : index
      %43 = vector.load %arg7[%c0_24, %c0_25] : memref<8x128xf32, #tpu.memory_space<vmem>>, vector<8x128xf32>
      tpu.vector_store %arg7[%c0_24, %c0_25], %42 {strides = array<i32>} : memref<8x128xf32, #tpu.memory_space<vmem>>, vector<8x128xf32>,
    } else {
    }
    return
  }
  func.func @transform_0(%arg0: i32) -> (i32, i32) {
    %c0_i32 = arith.constant 0 : i32
    %c0_i32_0 = arith.constant 0 : i32
    return %arg0, %c0_i32 : i32, i32
  }
  func.func @transform_1(%arg0: i32) -> (i32, i32) {
    %c0_i32 = arith.constant 0 : i32
    %c0_i32_0 = arith.constant 0 : i32
    return %c0_i32, %arg0 : i32, i32
  }
  func.func @transform_2(%arg0: i32) -> (i32, i32) {
    %c0_i32 = arith.constant 0 : i32
    %c0_i32_0 = arith.constant 0 : i32
    %c0_i32_1 = arith.constant 0 : i32
    return %c0_i32, %c0_i32_0 : i32, i32
  }
  func.func @transform_3(%arg0: i32) -> (i32, i32) {
    %c0_i32 = arith.constant 0 : i32
    %c0_i32_0 = arith.constant 0 : i32
    %c0_i32_1 = arith.constant 0 : i32
    return %c0_i32, %c0_i32_0 : i32, i32
  }
  func.func @transform_4(%arg0: i32) -> (i32, i32) {
    %c0_i32 = arith.constant 0 : i32
    %c0_i32_0 = arith.constant 0 : i32
    %c0_i32_1 = arith.constant 0 : i32
    return %c0_i32, %c0_i32_0 : i32, i32
  }
  func.func @transform_5(%arg0: i32) -> (i32, i32) {
    %c0_i32 = arith.constant 0 : i32
    %c0_i32_0 = arith.constant 0 : i32
    %c0_i32_1 = arith.constant 0 : i32
    return %c0_i32, %c0_i32_0 : i32, i32
  }
  func.func @transform_6(%arg0: i32) -> (i32, i32) {
    %c0_i32 = arith.constant 0 : i32
    %c0_i32_0 = arith.constant 0 : i32
    %c0_i32_1 = arith.constant 0 : i32
    return %c0_i32, %c0_i32_0 : i32, i32
  }
}

</mosaic_0001>

<bundles_post_ra>
// kernel: tpu_custom_call.1
= control target key start
LH: loop header
LB: loop body
LE: loop exit
PB: predicated region body
PF: predicated region fallthrough
CT: control target
= control target key end

     0   :  { %s1228_s0 = inlined_call_operand.vmem [shape: s32[384,1], index: 0, kind: input, shape index: {}]   ;;  %s1229_s1 = inlined_call_operand.vmem [shape: s32[1,384], index: 1, kind: input, shape index: {}]   ;;  %s1230_s2 = inlined_call_operand.vmem [shape: f32[128,128], index: 2, kind: input, shape index: {}]   ;;  %s1231_s3 = inlined_call_operand.vmem [shape: f32[1,128], index: 3, kind: input, shape index: {}]   ;;  %s1232_s4 = inlined_call_operand.vmem [shape: f32[128,128], index: 4, kind: input, shape index: {}]   ;;  %s1233_s5 = inlined_call_operand.<no memory space> [shape: f32[1,1], index: 5, kind: input, shape index: {}]   ;;  %s1234_s6 = inlined_call_operand.hbm [shape: f32[8,128], index: 6, kind: output, shape index: {}]  }
   0x1   :  { %11 = sst [smem:[#allocation3]] %s1233_s5 }
   0x2   :  { %12 = vsyncpa [#allocation5], 0  ;;  %s1027_s23 = smov 0  }
   0x3 LB: > { %s1033_s24 = sadd.s32 4294967295, %s978_s23   ;;  %p688_p0 = scmp.ge.s32.totalorder %s978_s23, 1  ;;  %s978_s23 = sphi %s1027_s23, %s18_s23  }
   0x4   : > { %p218_p1 = scmp.lt.s32.totalorder %s978_s23, 4 }
   0x6   : > { %p219_p2 = pnand %p688_p0, %p218_p1 }
   0x7   : > { %s689_s5 = sshll.u32 (!%p219_p2), %s1033_s24, 4  ;;  %p252_p3 = scmp.lt.s32.totalorder (!%p219_p2), %s1033_s24, 2 }
   0x8   : > { %222 = sbr.rel (%p219_p2) target bundleno = 1025 (0x401), region = 44  ;;  %p247_p4 = scmp.lt.s32.totalorder (!%p219_p2), %s689_s5, 47 }
   0x9   : > { %p691_p5 = scmp.ne.s32.totalorder (!%p219_p2), %s1033_s24, 0 }
   0xf   : > { %s1040_s25 = scalar_select %p252_p3, %s1033_s24, 2 }
  0x10   : > { %s1236_s5 = smov (!%p247_p4, %s689_s5), 47  ;;  %259 = sbr.rel (%p691_p5) target bundleno = 23 (0x17), region = 48 }
  0x11   : > { %s254_s28 = scalar_lea.vmem %s1229_s1, %s1040_s25  ;;  %s690_s29 = sshll.u32 %s1236_s5, 3  ;;  %v980_v0 = vmov (!%p691_p5), 0.0  }
  0x12   : > { %s1049_s8 = scalar_lea.vmem %s1228_s0, %s690_s29  ;;  %260 = vst [vmem:[#allocation2] sm:$0xff] (!%p691_p5), %v980_v0 }
  0x17 PF: > { %v263_v1 = vld [vmem:[%s1049_s8 + $0x10] sm:$0xff]  ;;  %v261_v2 = vld [vmem:[%s1049_s8] sm:$0xff]  ;;  %v981_v3 = vmov 0   ;;  %v264_v4 = vld [vmem:[%s1049_s8 + $0x18] sm:$0xff]  ;;  %v982_v8 = vmov 0.0   ;;  %vm983_vm0 = vmmov 0   ;;  %v278_v19 = vlaneseq }
  0x18   : > { %939 = vset.pattern.permute.xlu1 %v981_v3  ;;  %938 = vset.pattern.permute.xlu0 %v981_v3  ;;  %v262_v5 = vld [vmem:[%s1049_s8 + $0x8] sm:$0xff]  ;;  %v265_v7 = vld [vmem:[%s1049_s8 + $0x20] sm:$0xff]  ;;  %v268_v9 = vld [vmem:[%s1049_s8 + $0x38] sm:$0xff]  ;;  %v984_v25 = vmov 1.0|1.0   ;;  %p728_p6 = scmp.ne.s32.totalorder %s1033_s24, 2 }
  0x19   : > { %287 = vperm.xlu1 %939, %v263_v1   ;;  %281 = vperm.xlu0 %938, %v261_v2   ;;  %v266_v6 = vld [vmem:[%s1049_s8 + $0x28] sm:$0xff]  ;;  %v267_v10 = vld [vmem:[%s1049_s8 + $0x30] sm:$0xff]  ;;  %v269_v12 = vld [vmem:[%s1049_s8 + $0x40] sm:$0xff]  ;;  %v279_v22 = vand.u32 127, %v278_v19  ;;  %v385_v38 = vshrl.u32 %v278_v19, 7  ;;  %v985_v49 = vmov (!%p728_p6), 0.0|0.0  }
  0x1a   : > { %777 = vmatprep.subr.bf16.mxu0 %v982_v8  ;;  %v270_v11 = vld [vmem:[%s1049_s8 + $0x48] sm:$0xff]  ;;  %v272_v13 = vld [vmem:[%s1049_s8 + $0x58] sm:$0xff]  ;;  %v271_v14 = vld [vmem:[%s1049_s8 + $0x50] sm:$0xff]  ;;  %793 = vmatprep.mubr.msk.bf16.mxu0 %vm983_vm0, %v982_v8  ;;  %v987_v1 = vmov (!%p728_p6), 0.0  }
  0x1b   : > { %v274_v15 = vld [vmem:[%s1049_s8 + $0x68] sm:$0xff]  ;;  %v273_v16 = vld [vmem:[%s1049_s8 + $0x60] sm:$0xff]  ;;  %v276_v17 = vld [vmem:[%s1049_s8 + $0x78] sm:$0xff]  ;;  %891 = vmatprep.subr.bf16.mxu1 (!%p728_p6), %v985_v49 }
  0x1c   : > { %v275_v18 = vld [vmem:[%s1049_s8 + $0x70] sm:$0xff]  ;;  %v708_v39 = vld [vmem:[%s254_s28] ss:$0 sm:$0xff]  ;;  %v448_v48 = vld [vmem:[%s1230_s2 + $0x8] sm:$0xff] (!%p728_p6)  ;;  %s557_s8 = sld [smem:[#allocation3]] (!%p728_p6) }
  0x1d   : > { %290 = vperm.xlu1 %939, %v264_v4   ;;  %284 = vperm.xlu0 %938, %v262_v5   ;;  %v394_v40 = vld [vmem:[#allocation2] sm:$0xff]  ;;  %v449_v51 = vld [vmem:[%s1230_s2 + $0x10] sm:$0xff] (!%p728_p6)  ;;  %v450_v52 = vld [vmem:[%s1230_s2 + $0x18] sm:$0xff] (!%p728_p6) }
  0x1e   : > { %v447_v47 = vld [vmem:[%s1230_s2] sm:$0xff] (!%p728_p6)  ;;  %v871_v53 = vpack.c.bf16 (!%p728_p6), %v450_v52, %v449_v51  ;;  %v452_v55 = vld [vmem:[%s1230_s2 + $0x28] sm:$0xff] (!%p728_p6)  ;;  %v453_v57 = vld [vmem:[%s1230_s2 + $0x30] sm:$0xff] (!%p728_p6) }
  0x1f   : > { %v868_v50 = vpack.c.bf16 (!%p728_p6), %v448_v48, %v447_v47  ;;  %v451_v54 = vld [vmem:[%s1230_s2 + $0x20] sm:$0xff] (!%p728_p6)  ;;  %v454_v58 = vld [vmem:[%s1230_s2 + $0x38] sm:$0xff] (!%p728_p6)  ;;  %v456_v61 = vld [vmem:[%s1230_s2 + $0x48] sm:$0xff] (!%p728_p6) }
  0x20   : > { %v874_v56 = vpack.c.bf16 (!%p728_p6), %v452_v55, %v451_v54  ;;  %v877_v59 = vpack.c.bf16 (!%p728_p6), %v454_v58, %v453_v57  ;;  %v455_v60 = vld [vmem:[%s1230_s2 + $0x40] sm:$0xff] (!%p728_p6)  ;;  %v457_v63 = vld [vmem:[%s1230_s2 + $0x50] sm:$0xff] (!%p728_p6)  ;;  %v458_v0 = vld [vmem:[%s1230_s2 + $0x58] sm:$0xff] (!%p728_p6) }
  0x21   : > { %296 = vperm.xlu1 %939, %v266_v6   ;;  %293 = vperm.xlu0 %938, %v265_v7   ;;  %v880_v62 = vpack.c.bf16 (!%p728_p6), %v456_v61, %v455_v60  ;;  %v883_v2 = vpack.c.bf16 (!%p728_p6), %v458_v0, %v457_v63  ;;  %v459_v3 = vld [vmem:[%s1230_s2 + $0x60] sm:$0xff] (!%p728_p6)  ;;  %v460_v4 = vld [vmem:[%s1230_s2 + $0x68] sm:$0xff] (!%p728_p6)  ;;  %v461_v6 = vld [vmem:[%s1230_s2 + $0x70] sm:$0xff] (!%p728_p6) }
  0x22   : > { %v886_v5 = vpack.c.bf16 (!%p728_p6), %v460_v4, %v459_v3  ;;  %v462_v7 = vld [vmem:[%s1230_s2 + $0x78] sm:$0xff] (!%p728_p6) }
  0x23   : > { %v548_v19 = vld [vmem:[%s1232_s4 + $0x38] sm:$0xff] (!%p728_p6) }
  0x25   : > { %302 = vperm.xlu1 %939, %v268_v9   ;;  %299 = vperm.xlu0 %938, %v267_v10   ;;  %v541_v9 = vld [vmem:[%s1232_s4] sm:$0xff] (!%p728_p6)  ;;  %v542_v10 = vld [vmem:[%s1232_s4 + $0x8] sm:$0xff] (!%p728_p6) }
  0x29   : > { %308 = vperm.xlu1 %939, %v270_v11   ;;  %305 = vperm.xlu0 %938, %v269_v12   ;;  %v543_v11 = vld [vmem:[%s1232_s4 + $0x10] sm:$0xff] (!%p728_p6)  ;;  %v892_v12 = vpack.c.bf16 (!%p728_p6), %v542_v10, %v541_v9 }
  0x2b   : > { %893 = vmatpush3.bf16.msra.mxu1 (!%p728_p6), %v892_v12 }
  0x2c   : > { %894 = vmatprep.subr.bf16.mxu1 (!%p728_p6), %v985_v49 }
  0x2d   : > { %314 = vperm.xlu1 %939, %v272_v13   ;;  %311 = vperm.xlu0 %938, %v271_v14   ;;  %v544_v13 = vld [vmem:[%s1232_s4 + $0x18] sm:$0xff] (!%p728_p6) }
  0x2e   : > { %v895_v14 = vpack.c.bf16 (!%p728_p6), %v544_v13, %v543_v11 }
  0x30   : > { %896 = vmatpush3.bf16.msra.mxu1 (!%p728_p6), %v895_v14 }
  0x31   : > { %320 = vperm.xlu1 %939, %v274_v15   ;;  %317 = vperm.xlu0 %938, %v273_v16   ;;  %v545_v15 = vld [vmem:[%s1232_s4 + $0x20] sm:$0xff] (!%p728_p6)  ;;  %v546_v16 = vld [vmem:[%s1232_s4 + $0x28] sm:$0xff] (!%p728_p6) }
  0x32   : > { %897 = vmatprep.subr.bf16.mxu1 (!%p728_p6), %v985_v49 }
  0x35   : > { %326 = vperm.xlu1 %939, %v276_v17   ;;  %323 = vperm.xlu0 %938, %v275_v18   ;;  %v898_v17 = vpack.c.bf16 (!%p728_p6), %v546_v16, %v545_v15  ;;  %v547_v18 = vld [vmem:[%s1232_s4 + $0x30] sm:$0xff] (!%p728_p6) }
  0x37   : > { %899 = vmatpush3.bf16.msra.mxu1 (!%p728_p6), %v898_v17 }
  0x38   : > { %900 = vmatprep.subr.bf16.mxu1 (!%p728_p6), %v985_v49 }
  0x98   : > { %v288_v20 = vpop.permute.xlu1 %287  ;;  %v282_v21 = vpop.permute.xlu0 %281 }
  0x99   : > { %vm328_vm2 = vcmp.eq.s32.totalorder %v279_v22, %v282_v21  ;;  %vm330_vm4 = vcmp.eq.s32.totalorder %v279_v22, %v288_v20  ;;  %v901_v20 = vpack.c.bf16 (!%p728_p6), %v548_v19, %v547_v18  ;;  %v549_v21 = vld [vmem:[%s1232_s4 + $0x40] sm:$0xff] (!%p728_p6) }
  0x9b   : > { %902 = vmatpush3.bf16.msra.mxu1 (!%p728_p6), %v901_v20 }
  0x9c   : > { %v291_v23 = vpop.permute.xlu1 %290  ;;  %v285_v24 = vpop.permute.xlu0 %284  ;;  %903 = vmatprep.subr.bf16.mxu1 (!%p728_p6), %v985_v49 }
  0x9d   : > { %vm329_vm1 = vcmp.eq.s32.totalorder %v279_v22, %v285_v24  ;;  %vm331_vm5 = vcmp.eq.s32.totalorder %v279_v22, %v291_v23  ;;  %v551_v24 = vld [vmem:[%s1232_s4 + $0x50] sm:$0xff] (!%p728_p6) }
  0x9e   : > { %vm710_vm3 = vmpackc.low %vm329_vm1, %vm328_vm2 }
  0x9f   : > { %778 = vmatpush3.bf16.msk.msra.mxu0 %vm710_vm3, %v984_v25  ;;  %vm712_vm6 = vmpackc.low %vm331_vm5, %vm330_vm4 }
  0xa0   : > { %v297_v26 = vpop.permute.xlu1 %296  ;;  %v294_v27 = vpop.permute.xlu0 %293  ;;  %779 = vmatprep.subr.bf16.mxu0 %v982_v8 }
  0xa1   : > { %vm333_vm7 = vcmp.eq.s32.totalorder %v279_v22, %v297_v26  ;;  %vm332_vm8 = vcmp.eq.s32.totalorder %v279_v22, %v294_v27  ;;  %v553_v27 = vld [vmem:[%s1232_s4 + $0x60] sm:$0xff] (!%p728_p6) }
  0xa2   : > { %vm714_vm9 = vmpackc.low %vm333_vm7, %vm332_vm8  ;;  %vm390_vm8 = vcmp.eq.s32.totalorder %v385_v38, %v708_v39 }
  0xa3   : > { %780 = vmatpush3.bf16.msk.msra.mxu0 %vm712_vm6, %v984_v25 }
  0xa4   : > { %v303_v28 = vpop.permute.xlu1 %302  ;;  %v300_v29 = vpop.permute.xlu0 %299  ;;  %781 = vmatprep.subr.bf16.mxu0 %v982_v8 }
  0xa5   : > { %vm335_vm10 = vcmp.eq.s32.totalorder %v279_v22, %v303_v28  ;;  %vm334_vm11 = vcmp.eq.s32.totalorder %v279_v22, %v300_v29  ;;  %v554_v28 = vld [vmem:[%s1232_s4 + $0x68] sm:$0xff] (!%p728_p6) }
  0xa6   : > { %vm716_vm12 = vmpackc.low %vm335_vm10, %vm334_vm11  ;;  %vm986_vm11 = vmmov (!%p728_p6), 0   ;;  %v910_v29 = vpack.c.bf16 (!%p728_p6), %v554_v28, %v553_v27 }
  0xa7   : > { %782 = vmatpush3.bf16.msk.msra.mxu0 %vm714_vm9, %v984_v25  ;;  %vm726_vm10 = vmpackc.low %vm390_vm8, %vm390_vm8  ;;  %864 = vmatprep.mubr.msk.f32.mxu1 (!%p728_p6), %vm986_vm11, %v987_v1 }
  0xa8   : > { %v309_v30 = vpop.permute.xlu1 %308  ;;  %v306_v31 = vpop.permute.xlu0 %305  ;;  %783 = vmatprep.subr.bf16.mxu0 %v982_v8 }
  0xa9   : > { %vm337_vm13 = vcmp.eq.s32.totalorder %v279_v22, %v309_v30  ;;  %vm336_vm14 = vcmp.eq.s32.totalorder %v279_v22, %v306_v31 }
  0xaa   : > { %vm718_vm15 = vmpackc.low %vm337_vm13, %vm336_vm14 }
  0xab   : > { %784 = vmatpush3.bf16.msk.msra.mxu0 %vm716_vm12, %v984_v25 }
  0xac   : > { %v315_v32 = vpop.permute.xlu1 %314  ;;  %v312_v33 = vpop.permute.xlu0 %311  ;;  %785 = vmatprep.subr.bf16.mxu0 %v982_v8 }
  0xad   : > { %vm339_vm0 = vcmp.eq.s32.totalorder %v279_v22, %v315_v32  ;;  %vm338_vm1 = vcmp.eq.s32.totalorder %v279_v22, %v312_v33 }
  0xae   : > { %vm720_vm2 = vmpackc.low %vm339_vm0, %vm338_vm1 }
  0xaf   : > { %786 = vmatpush3.bf16.msk.msra.mxu0 %vm718_vm15, %v984_v25 }
  0xb0   : > { %v321_v34 = vpop.permute.xlu1 %320  ;;  %v318_v35 = vpop.permute.xlu0 %317  ;;  %787 = vmatprep.subr.bf16.mxu0 %v982_v8 }
  0xb1   : > { %vm341_vm3 = vcmp.eq.s32.totalorder %v279_v22, %v321_v34  ;;  %vm340_vm4 = vcmp.eq.s32.totalorder %v279_v22, %v318_v35  ;;  %v555_v34 = vld [vmem:[%s1232_s4 + $0x70] sm:$0xff] (!%p728_p6)  ;;  %v556_v35 = vld [vmem:[%s1232_s4 + $0x78] sm:$0xff] (!%p728_p6) }
  0xb2   : > { %vm722_vm5 = vmpackc.low %vm341_vm3, %vm340_vm4 }
  0xb3   : > { %788 = vmatpush3.bf16.msk.msra.mxu0 %vm720_vm2, %v984_v25 }
  0xb4   : > { %v327_v36 = vpop.permute.xlu1 %326  ;;  %v324_v37 = vpop.permute.xlu0 %323  ;;  %789 = vmatprep.subr.bf16.mxu0 %v982_v8 }
  0xb5   : > { %vm343_vm6 = vcmp.eq.s32.totalorder %v279_v22, %v327_v36  ;;  %vm342_vm7 = vcmp.eq.s32.totalorder %v279_v22, %v324_v37  ;;  %v550_v22 = vld [vmem:[%s1232_s4 + $0x48] sm:$0xff] (!%p728_p6)  ;;  %v913_v36 = vpack.c.bf16 (!%p728_p6), %v556_v35, %v555_v34  ;;  %v729_v37 = vld [vmem:[%s1231_s3] ss:$0 sm:$0xff] (!%p728_p6) }
  0xb6   : > { %vm724_vm9 = vmpackc.low %vm343_vm6, %vm342_vm7  ;;  %v904_v23 = vpack.c.bf16 (!%p728_p6), %v550_v22, %v549_v21 }
  0xb7   : > { %790 = vmatpush3.bf16.msk.msra.mxu0 %vm722_vm5, %v984_v25 }
  0xb8   : > { %791 = vmatprep.subr.bf16.mxu0 %v982_v8  ;;  %v889_v8 = vpack.c.bf16 (!%p728_p6), %v462_v7, %v461_v6  ;;  %905 = vmatpush3.bf16.msra.mxu1 (!%p728_p6), %v904_v23 }
  0xb9   : > { %906 = vmatprep.subr.bf16.mxu1 (!%p728_p6), %v985_v49 }
  0xbb   : > { %792 = vmatpush3.bf16.msk.msra.mxu0 %vm724_vm9, %v984_v25 }
  0xbc   : > { %867 = vmatprep.subr.bf16.mxu0 (!%p728_p6), %v985_v49 }
  0xbe   : > { %794 = vmatmul.mubr.msk.bf16.vlgmr.msra.gmra.mrb[0].mxu0 %vm726_vm10, %v984_v25  ;;  %v552_v25 = vld [vmem:[%s1232_s4 + $0x58] sm:$0xff] (!%p728_p6) }
  0xbf   : > { %869 = vmatpush3.bf16.msra.mxu0 (!%p728_p6), %v868_v50  ;;  %829 = vmatprep.mubr.msk.f32.mxu0 (!%p728_p6), %vm986_vm11, %v987_v1  ;;  %v907_v26 = vpack.c.bf16 (!%p728_p6), %v552_v25, %v551_v24 }
  0xc0   : > { %870 = vmatprep.subr.bf16.mxu0 (!%p728_p6), %v985_v49 }
  0xc1   : > { %908 = vmatpush3.bf16.msra.mxu1 (!%p728_p6), %v907_v26 }
  0xc2   : > { %909 = vmatprep.subr.bf16.mxu1 (!%p728_p6), %v985_v49 }
  0xc3   : > { %872 = vmatpush3.bf16.msra.mxu0 (!%p728_p6), %v871_v53 }
  0xc4   : > { %873 = vmatprep.subr.bf16.mxu0 (!%p728_p6), %v985_v49 }
  0xc5   : > { %911 = vmatpush3.bf16.msra.mxu1 (!%p728_p6), %v910_v29 }
  0xc6   : > { %912 = vmatprep.subr.bf16.mxu1 (!%p728_p6), %v985_v49 }
  0xc7   : > { %875 = vmatpush3.bf16.msra.mxu0 (!%p728_p6), %v874_v56 }
  0xc8   : > { %876 = vmatprep.subr.bf16.mxu0 (!%p728_p6), %v985_v49 }
  0xc9   : > { %914 = vmatpush3.bf16.msra.mxu1 (!%p728_p6), %v913_v36 }
  0xcb   : > { %878 = vmatpush3.bf16.msra.mxu0 (!%p728_p6), %v877_v59 }
  0xcc   : > { %879 = vmatprep.subr.bf16.mxu0 (!%p728_p6), %v985_v49 }
  0xcf   : > { %881 = vmatpush3.bf16.msra.mxu0 (!%p728_p6), %v880_v62 }
  0xd0   : > { %882 = vmatprep.subr.bf16.mxu0 (!%p728_p6), %v985_v49 }
  0xd3   : > { %884 = vmatpush3.bf16.msra.mxu0 (!%p728_p6), %v883_v2 }
  0xd4   : > { %885 = vmatprep.subr.bf16.mxu0 (!%p728_p6), %v985_v49 }
  0xd7   : > { %887 = vmatpush3.bf16.msra.mxu0 (!%p728_p6), %v886_v5 }
  0xd8   : > { %888 = vmatprep.subr.bf16.mxu0 (!%p728_p6), %v985_v49 }
  0xdb   : > { %890 = vmatpush3.bf16.msra.mxu0 (!%p728_p6), %v889_v8 }
 0x18e   : > { %440 = sbr.rel (%p728_p6) target bundleno = 1000 (0x3e8), region = 52 }
 0x191   : > { %v429_v41 = vpop.f32.mrb[0].mxu0 }
 0x192   : > { %v435_v42 = vadd.f32 %v429_v41, %v394_v40  ;;  %v795_v43 = vpop.f32.mrb[1].mxu0 }
 0x193   : > { %v432_v44 = vpop.f32.mrb[2].mxu0 }
 0x194   : > { %436 = vst [vmem:[#allocation2] sm:$0xff] %v435_v42  ;;  %v796_v45 = vpop.f32.mrb[3].mxu0  ;;  %v558_v42 = vstv (!%p728_p6), %s557_s8 }
 0x19b   : > { %v1083_v46 = vld [vmem:[#allocation2] sm:$0xff] }
 0x19c   : > { %442 = vadd.xlane.f32.xlu0 %v1083_v46 }
 0x229   : > { %v443_v30 = vpop.xlane.xlu0 %442 }
 0x22a   : > { %v444_v31 = vmax.f32 %v443_v30, 1.0 }
 0x22c   : > { %940 = vrcp.f32 %v444_v31 }
 0x236   : > { %v941_v32 = vpop.eup %940 }
 0x237   : > { %v446_v33 = vmul.f32 %v941_v32, %v1083_v46 }
 0x239   : > { %830 = vmatmul.mubr.f32.vlgmr.msra.gmra.mrb[0].mxu0 %v446_v33 }
 0x30c   : > { %v536_v38 = vpop.f32.mrb[0].mxu0 }
 0x30d   : > { %v537_v39 = vadd.f32 %v729_v37, %v536_v38  ;;  %v831_v40 = vpop.f32.mrb[1].mxu0 }
 0x30f   : > { %v540_v41 = vmax.f32 %v537_v39, 0.0 }
 0x311   : > { %865 = vmatmul.mubr.f32.vlgmr.msra.gmra.mrb[0].mxu1 %v540_v41 }
 0x3e4   : > { %v625_v43 = vpop.f32.mrb[0].mxu1 }
 0x3e5   : > { %v626_v44 = vadd.f32 %v625_v43, %v558_v42  ;;  %v866_v45 = vpop.f32.mrb[1].mxu1 }
 0x3e7   : > { %629 = vst [vmem:[#allocation4] sm:$0xff] %v626_v44 }
 0x3e8 PF: > { %p919_p7 = scmp.eq.s32.totalorder %s1033_s24, 2  ;;  %s988_s9 = smov [#allocation4]  }
 0x3e9   : > { %s637_s10 = sshll.u32 %s988_s9, 4  ;;  %s638_s10 = int_to_ptr.vmem [resolvable:$true] %s637_s10 }
 0x3ea   : > { %s942_s11 = scalar_lea.vmem %s638_s10, 128  ;;  %p949_p11 = scmp.lt.s32.totalorder %s638_s10, %s638_s10 }
 0x3eb   : > { %p943_p8 = scmp.ne.s32.totalorder %s638_s10, %s942_s11  ;;  %p950_p12 = scmp.lt.s32.totalorder %s942_s11, %s942_s11 }
 0x3ed   : > { %p944_p9 = pnand %p943_p8, %p919_p7  ;;  %p951_p13 = por %p950_p12, %p949_p11 }
 0x3ef   : > { %p945_p10 = pneg %p944_p9 }
 0x3f1   : > { %p952_p0 = pnand %p951_p13, %p945_p10 }
 0x3f3   : > { %955 = shalt.err (!%p952_p0)
}
 0x3f4   : > { %s956_s14 = scalar_lea.hbm %s1234_s6, 128 }
 0x3f5   : > { %p957_p1 = scmp.ne.s32.totalorder %s1234_s6, %s956_s14  ;;  %p962_p4 = scmp.lt.u32.totalorder %s956_s14, %s1234_s6 }
 0x3f7   : > { %p958_p2 = pnand %p957_p1, %p919_p7 }
 0x3f9   : > { %p959_p3 = pneg %p958_p2 }
 0x3fb   : > { %p964_p5 = pnand %p962_p4, %p959_p3 }
 0x3fd   : > { %967 = shalt.err (!%p964_p5)
}
 0x3fe   : > { %916 = dma.vmem_to_hbm [thread:$0]  (%p919_p7), %s638_s10, 128, %s1234_s6, [#allocation5]  }
 0x3ff   : > { %973 = dma.done.wait (%p919_p7), [#allocation5], 128  }
 0x400   : > { %975 = vsyncadd (%p919_p7), [#allocation5], 4294967168 }
 0x401 PF: > { %s18_s23 = sadd.s32 1, %s978_s23  }
 0x402   : > { %p15_p6 = scmp.ge.s32.totalorder %s18_s23, 5  }
 0x404   :  { %17 = sbr.rel (!%p15_p6) target bundleno = 3 (0x3), region = 82 }
 0x40b   :  { %650 = vsyncpa [#allocation5], 1 }
 0x40c   :  { %652 = vsyncpa [#allocation5 + $0x1], 1 }

</bundles_post_ra>
